<compile_context>
chip_gen: v6e
topology: v6e:2x2x1
jax: 0.10.0
libtpu: 0.0.40
codegen_flags: <defaults>
</compile_context>

<pallas_src>
import jax
import jax.numpy as jnp
import numpy as np
from jax.experimental import pallas as pl
from jax.experimental.pallas import tpu as pltpu

EPS = 1e-5
NEG = -1e30          # bias for padded logit lanes -> exp() underflows to exact 0
LANES = 128          # lane-dense feature width


def _compiler_params(**kw):
    """pltpu.CompilerParams with a fallback for older spellings."""
    cp = getattr(pltpu, "CompilerParams", None) or getattr(
        pltpu, "TPUCompilerParams", None)
    return cp(**kw) if cp is not None else None


# ----------------------------------------------------------------------------
# Kernels
# ----------------------------------------------------------------------------
def _mm(h, w):
    """MXU matmul: operands in the (possibly bf16) weight dtype, f32 accumulate."""
    return jnp.dot(h.astype(w.dtype), w, preferred_element_type=jnp.float32)


def _softmax_rows(logits, out_ref):
    m = jnp.max(logits, axis=1, keepdims=True)
    e = jnp.exp(logits - m)
    denom = jnp.sum(e, axis=1, keepdims=True)
    out_ref[...] = (e / denom).astype(out_ref.dtype)      # exact divide


def _actor_eval_kernel(x_ref, w1_ref, wslab_ref, bslab_ref, out_ref):
    """Eval-mode (BN folded into Linear): 4 matmuls + ReLU + softmax.

    x_ref:     (TILE_B, S)      f32
    w1_ref:    (S, 128)         folded layer-1 weight (matmul dtype)
    wslab_ref: (3, 128, 128)    folded W2, folded+padded W3, padded W4
    bslab_ref: (4, 128) f32     folded b1, b2, b3(pad 0), b4(pad -1e30)
    out_ref:   (TILE_B, 128)    softmax probs, lane-dense (padded lanes == 0)
    """
    x = x_ref[...].astype(jnp.float32)
    h = jnp.maximum(_mm(x, w1_ref[...]) + bslab_ref[0:1, :], 0.0)
    h = jnp.maximum(_mm(h, wslab_ref[0]) + bslab_ref[1:2, :], 0.0)
    h = jnp.maximum(_mm(h, wslab_ref[1]) + bslab_ref[2:3, :], 0.0)
    logits = _mm(h, wslab_ref[2]) + bslab_ref[3:4, :]      # padded lanes -> -1e30
    _softmax_rows(logits, out_ref)


def _actor_train_kernel(x_ref, w1_ref, wslab_ref, pslab_ref, out_ref):
    """Training-mode (batch-statistics BatchNorm), full batch in one block.

    pslab rows: 0:b1 1:g1 2:bt1 3:b2 4:g2 5:bt2 6:b3 7:g3 8:bt3 9:b4(pad -1e30)
    """
    x = x_ref[...].astype(jnp.float32)

    def layer(h, w, r):
        h = _mm(h, w) + pslab_ref[r:r + 1, :]
        mean = jnp.mean(h, axis=0, keepdims=True)
        c = h - mean
        var = jnp.mean(c * c, axis=0, keepdims=True)       # biased (1/N)
        h_hat = c * jax.lax.rsqrt(var + EPS)
        h_bn = h_hat * pslab_ref[r + 1:r + 2, :] + pslab_ref[r + 2:r + 3, :]
        return jnp.maximum(h_bn, 0.0)

    h = layer(x, w1_ref[...], 0)
    h = layer(h, wslab_ref[0], 3)
    h = layer(h, wslab_ref[1], 6)
    logits = _mm(h, wslab_ref[2]) + pslab_ref[9:10, :]
    _softmax_rows(logits, out_ref)


# ----------------------------------------------------------------------------
# Parameter packing / padding (wrapper side, pure JAX)
# ----------------------------------------------------------------------------
def _pad_lanes(a, target, value=0.0):
    pad = target - a.shape[-1]
    if pad <= 0:
        return a
    return jnp.pad(a, [(0, 0)] * (a.ndim - 1) + [(0, pad)], constant_values=value)


def _pad_rows(a, target):
    pad = target - a.shape[0]
    if pad <= 0:
        return a
    return jnp.pad(a, [(0, pad)] + [(0, 0)] * (a.ndim - 1))


def _prepare_eval_params(params, matmul_dtype):
    """Fold BN (running stats) into the Linears; pad to 128 lanes; pack slabs."""
    def fold(w, b, g, bt, rm, rv):
        scale = g * jax.lax.rsqrt(rv + EPS)               # (1, out)
        return w * scale, (b - rm) * scale + bt

    w1f, b1f = fold(params["w1"], params["b1"], params["g1"], params["bt1"],
                    params["rm1"], params["rv1"])
    w2f, b2f = fold(params["w2"], params["b2"], params["g2"], params["bt2"],
                    params["rm2"], params["rv2"])
    w3f, b3f = fold(params["w3"], params["b3"], params["g3"], params["bt3"],
                    params["rm3"], params["rv3"])

    w3f = _pad_lanes(w3f, LANES)                          # (128, 64) -> (128, 128)
    b3f = _pad_lanes(b3f, LANES)
    w4p = _pad_rows(_pad_lanes(params["w4"], LANES), LANES)   # (64,A)->(128,128)
    b4p = _pad_lanes(params["b4"], LANES, value=NEG)

    w1 = w1f.astype(matmul_dtype)
    wslab = jnp.stack([w2f, w3f, w4p]).astype(matmul_dtype)       # (3,128,128)
    bslab = jnp.concatenate([b1f, b2f, b3f, b4p], 0).astype(jnp.float32)  # (4,128)
    return w1, wslab, bslab


def _prepare_train_params(params, matmul_dtype):
    """Raw (unfused) params, padded to 128 lanes and packed into slabs."""
    w3p = _pad_lanes(params["w3"], LANES)
    w4p = _pad_rows(_pad_lanes(params["w4"], LANES), LANES)
    w1 = params["w1"].astype(matmul_dtype)
    wslab = jnp.stack([params["w2"], w3p, w4p]).astype(matmul_dtype)

    rows = [
        params["b1"], params["g1"], params["bt1"],
        params["b2"], params["g2"], params["bt2"],
        _pad_lanes(params["b3"], LANES), _pad_lanes(params["g3"], LANES),
        _pad_lanes(params["bt3"], LANES),
        _pad_lanes(params["b4"], LANES, value=NEG),
    ]
    pslab = jnp.concatenate(rows, axis=0).astype(jnp.float32)     # (10, 128)
    return w1, wslab, pslab


def _full_spec(shape):
    return pl.BlockSpec(shape, lambda: (0,) * len(shape))


# ----------------------------------------------------------------------------
# pallas_call wrappers
# ----------------------------------------------------------------------------
def _pick_tile_b(B, tile_b):
    if tile_b is None:
        tb = min(2048, B)                     # per-step overhead >> per-tile compute
        if B >= 256 and pl.cdiv(B, tb) < 2:   # keep >=2 grid steps for v7x megacore
            tb = -(-((B + 1) // 2) // 8) * 8
    else:
        tb = min(tile_b, B)
    if tb != B:
        tb = max(8, (tb // 8) * 8)            # honor (8,128) sublane constraint
    return tb


def _eval_pallas_call(x, w1, wslab, bslab, tile_b=None):
    """Folded-BN eval path: batch-tiled, pipelined, megacore-parallel."""
    B, S = x.shape
    tb = _pick_tile_b(B, tile_b)
    grid = (pl.cdiv(B, tb),)
    return pl.pallas_call(
        _actor_eval_kernel,
        out_shape=jax.ShapeDtypeStruct((B, LANES), jnp.float32),
        grid=grid,
        in_specs=[
            pl.BlockSpec((tb, S), lambda i: (i, 0)),
            # Grid-invariant blocks: DMA'd once, stay resident in VMEM.
            # TODO(synk): pipeline_mode=pl.Buffered(1) to drop the unused
            # second buffer once confirmed supported on the target JAX.
            pl.BlockSpec(w1.shape, lambda i: (0, 0)),
            pl.BlockSpec(wslab.shape, lambda i: (0, 0, 0)),
            pl.BlockSpec(bslab.shape, lambda i: (0, 0)),
        ],
        out_specs=pl.BlockSpec((tb, LANES), lambda i: (i, 0)),
        compiler_params=_compiler_params(dimension_semantics=("parallel",)),
    )(x, w1, wslab, bslab)


def _train_pallas_call(x, w1, wslab, pslab):
    """Batch-statistics BN: full batch in one block so stats are full-batch."""
    B, S = x.shape
    # x + ~8 live (B,128) f32 activations + output + weights, 2x headroom.
    est = 4 * B * (S + 9 * LANES) + 4 * (S * LANES + 3 * LANES * LANES) + (4 << 20)
    vmem_limit = int(min(128 * 2 ** 20, max(2 * est, 32 * 2 ** 20)))
    return pl.pallas_call(
        _actor_train_kernel,
        out_shape=jax.ShapeDtypeStruct((B, LANES), jnp.float32),
        grid=(),
        in_specs=[_full_spec(x.shape), _full_spec(w1.shape),
                  _full_spec(wslab.shape), _full_spec(pslab.shape)],
        out_specs=_full_spec((B, LANES)),
        compiler_params=_compiler_params(vmem_limit_bytes=vmem_limit),
    )(x, w1, wslab, pslab)


# ----------------------------------------------------------------------------
# Forward wrappers
# ----------------------------------------------------------------------------
def actor_forward(x, params, training=True, *, matmul_dtype=jnp.bfloat16,
                  tile_b=None, slice_output=False):
    """x: (B, state_size) f32. Returns softmax probabilities.

    By default returns the lane-dense (B, 128) array written by the kernel;
    columns >= action_size are EXACT zeros, so downstream sampling / log-prob
    can consume it directly (avoids an extra HBM pass).  slice_output=True
    returns the (B, action_size) view like the PyTorch module.
    """
    B, S = x.shape
    A = params["w4"].shape[1]
    assert A <= LANES, "action_size > 128 not supported by the packed slabs"
    use_batch_stats = training and B > 1      # mirrors `if x.size(0) == 1: eval()`

    if use_batch_stats:
        w1, wslab, pslab = _prepare_train_params(params, matmul_dtype)
        out = _train_pallas_call(x, w1, wslab, pslab)
    else:
        w1, wslab, bslab = _prepare_eval_params(params, matmul_dtype)
        out = _eval_pallas_call(x, w1, wslab, bslab, tile_b)
    return out[:, :A] if slice_output else out


def make_eval_forward(params, *, matmul_dtype=jnp.bfloat16, tile_b=None,
                      slice_output=False):
    """Pre-fold BN into the Linears once and return a jitted per-step forward.

    For B==1 rollout loops the BN fold + slab packing dominate latency if done
    every env step; here the packed (bf16) slabs stay resident on device.
    TODO(synk): cross-pallas_call weight prefetch (P10) to also hide the
    ~100 KB weight DMA behind the preceding env step.
    """
    A = params["w4"].shape[1]
    packed = _prepare_eval_params(params, matmul_dtype)

    @jax.jit
    def fwd(x):
        out = _eval_pallas_call(x, *packed, tile_b=tile_b)
        return out[:, :A] if slice_output else out

    return fwd


# ----------------------------------------------------------------------------
# Synthetic params + pure-JAX reference
# ----------------------------------------------------------------------------
def init_params(key, state_size, action_size):
    dims = [(state_size, 128), (128, 128), (128, 64), (64, action_size)]
    params = {}
    keys = jax.random.split(key, 2 * len(dims))
    for i, (fan_in, fan_out) in enumerate(dims):
        bound = 1.0 / np.sqrt(fan_in)
        params[f"w{i+1}"] = jax.random.uniform(
            keys[2 * i], (fan_in, fan_out), jnp.float32, -bound, bound)
        params[f"b{i+1}"] = jax.random.uniform(
            keys[2 * i + 1], (1, fan_out), jnp.float32, -bound, bound)
    for i, (_, fan_out) in enumerate(dims[:3]):
        params[f"g{i+1}"] = jnp.ones((1, fan_out), jnp.float32)
        params[f"bt{i+1}"] = jnp.zeros((1, fan_out), jnp.float32)
        params[f"rm{i+1}"] = 0.1 * jax.random.normal(
            jax.random.fold_in(key, 100 + i), (1, fan_out), jnp.float32)
        params[f"rv{i+1}"] = jnp.ones((1, fan_out), jnp.float32) + 0.1 * jnp.abs(
            jax.random.normal(jax.random.fold_in(key, 200 + i), (1, fan_out)))
    return params


def actor_forward_ref(x, params, use_batch_stats):
    h = x
    for i in range(1, 4):
        h = h @ params[f"w{i}"] + params[f"b{i}"]
        if use_batch_stats:
            mean = jnp.mean(h, axis=0, keepdims=True)
            var = jnp.mean((h - mean) ** 2, axis=0, keepdims=True)
        else:
            mean, var = params[f"rm{i}"], params[f"rv{i}"]
        h = (h - mean) / jnp.sqrt(var + EPS) * params[f"g{i}"] + params[f"bt{i}"]
        h = jnp.maximum(h, 0.0)
    logits = h @ params["w4"] + params["b4"]
    return jax.nn.softmax(logits, axis=1)


if __name__ == "__main__":
    state_size = 16
    action_size = 8
    A = action_size

    key = jax.random.PRNGKey(0)
    pkey, xkey1, xkey2 = jax.random.split(key, 3)
    params = init_params(pkey, state_size, action_size)

    def check(out_padded, ref, rtol, atol):
        out_np = np.asarray(out_padded)
        # Padded lanes are exact zeros (logit bias -1e30 -> exp underflows to 0).
        np.testing.assert_array_equal(out_np[:, A:], 0.0)
        # Exact softmax divide -> rows sum to 1 to f32 precision.
        np.testing.assert_allclose(out_np.sum(axis=1),
                                   np.ones(out_np.shape[0]), atol=1e-5)
        np.testing.assert_allclose(out_np[:, :A], np.asarray(ref),
                                   rtol=rtol, atol=atol)

    # 1) Training, B > 1 -> batch-statistics BN (full-batch kernel), f32 matmuls.
    x8 = jax.random.normal(xkey1, (8, state_size), jnp.float32)
    out = jax.block_until_ready(
        actor_forward(x8, params, training=True, matmul_dtype=jnp.float32))
    check(out, actor_forward_ref(x8, params, use_batch_stats=True), 2e-2, 2e-3)

    # 2) B == 1 -> eval mode (running stats), BN-folded kernel, f32 matmuls.
    out1 = jax.block_until_ready(
        actor_forward(x8[:1], params, training=True, matmul_dtype=jnp.float32))
    check(out1, actor_forward_ref(x8[:1], params, use_batch_stats=False),
          2e-2, 2e-3)

    # 3) Eval, B > 1 -> exercises the batch-tiled / pipelined grid path.
    x32 = jax.random.normal(xkey2, (32, state_size), jnp.float32)
    out32 = jax.block_until_ready(
        actor_forward(x32, params, training=False, matmul_dtype=jnp.float32,
                      tile_b=8))
    ref32 = actor_forward_ref(x32, params, use_batch_stats=False)
    check(out32, ref32, 2e-2, 2e-3)

    # 4) Default fast path: bf16 MXU operands, pre-folded slabs, jitted closure.
    fwd = make_eval_forward(params)
    outb = jax.block_until_ready(fwd(x32))
    check(outb, ref32, 5e-2, 5e-3)

    # 5) Default fast path, training statistics (bf16 matmuls, f32 BN/softmax).
    outt = jax.block_until_ready(actor_forward(x8, params, training=True))
    check(outt, actor_forward_ref(x8, params, use_batch_stats=True), 5e-2, 5e-3)

    print("KERNEL_OK")
</pallas_src>

<mosaic_0001>
module attributes {stable_mosaic.version = 11 : i64} {
  func.func @_actor_train_kernel(%arg0: memref<8x16xf32, #tpu.memory_space<vmem>>, %arg1: memref<16x128xf32, #tpu.memory_space<vmem>>, %arg2: memref<3x128x128xf32, #tpu.memory_space<vmem>>, %arg3: memref<10x128xf32, #tpu.memory_space<vmem>>, %arg4: memref<8x128xf32, #tpu.memory_space<vmem>>) attributes {dimension_semantics = [], scalar_prefetch = 0 : i64, scratch_operands = 0 : i64, tpu.core_type = #tpu.core_type<tc>} {
    %c0 = arith.constant 0 : index
    %c0_0 = arith.constant 0 : index
    %0 = vector.load %arg0[%c0, %c0_0] : memref<8x16xf32, #tpu.memory_space<vmem>>, vector<8x16xf32>
    %c0_1 = arith.constant 0 : index
    %c0_2 = arith.constant 0 : index
    %1 = vector.load %arg1[%c0_1, %c0_2] : memref<16x128xf32, #tpu.memory_space<vmem>>, vector<16x128xf32>
    %cst = arith.constant dense<0.000000e+00> : vector<8x128xf32>
    %2 = tpu.matmul %0, %1, %cst {dimension_numbers = #tpu.dot_dimension_numbers<[1], [0], [0], [1], [0, 0, 1, 1], [], []>} : vector<8x16xf32>, vector<16x128xf32>, vector<8x128xf32> -> vector<8x128xf32>
    %c0_3 = arith.constant 0 : index
    %c0_4 = arith.constant 0 : index
    %3 = vector.load %arg3[%c0_3, %c0_4] : memref<10x128xf32, #tpu.memory_space<vmem>>, vector<1x128xf32>
    %4 = vector.broadcast %3 : vector<1x128xf32> to vector<8x128xf32>
    %5 = arith.addf %2, %4 : vector<8x128xf32>
    %cst_5 = arith.constant dense<0.000000e+00> : vector<128xf32>
    %6 = vector.multi_reduction <add>, %5, %cst_5 [0] : vector<8x128xf32> to vector<128xf32>
    %7 = vector.shape_cast %6 : vector<128xf32> to vector<1x128xf32>
    %cst_6 = arith.constant 8.000000e+00 : f32
    %8 = vector.broadcast %cst_6 : f32 to vector<1x128xf32>
    %9 = arith.divf %7, %8 : vector<1x128xf32>
    %10 = vector.broadcast %9 : vector<1x128xf32> to vector<8x128xf32>
    %11 = arith.subf %5, %10 : vector<8x128xf32>
    %12 = arith.mulf %11, %11 : vector<8x128xf32>
    %cst_7 = arith.constant dense<0.000000e+00> : vector<128xf32>
    %13 = vector.multi_reduction <add>, %12, %cst_7 [0] : vector<8x128xf32> to vector<128xf32>
    %14 = vector.shape_cast %13 : vector<128xf32> to vector<1x128xf32>
    %cst_8 = arith.constant 8.000000e+00 : f32
    %15 = vector.broadcast %cst_8 : f32 to vector<1x128xf32>
    %16 = arith.divf %14, %15 : vector<1x128xf32>
    %cst_9 = arith.constant 9.99999974E-6 : f32
    %17 = vector.broadcast %cst_9 : f32 to vector<1x128xf32>
    %18 = arith.addf %16, %17 : vector<1x128xf32>
    %19 = math.rsqrt %18 : vector<1x128xf32>
    %20 = vector.broadcast %19 : vector<1x128xf32> to vector<8x128xf32>
    %21 = arith.mulf %11, %20 : vector<8x128xf32>
    %c1 = arith.constant 1 : index
    %c0_10 = arith.constant 0 : index
    %22 = vector.load %arg3[%c1, %c0_10] : memref<10x128xf32, #tpu.memory_space<vmem>>, vector<1x128xf32>
    %23 = vector.broadcast %22 : vector<1x128xf32> to vector<8x128xf32>
    %24 = arith.mulf %21, %23 : vector<8x128xf32>
    %c2 = arith.constant 2 : index
    %c0_11 = arith.constant 0 : index
    %25 = vector.load %arg3[%c2, %c0_11] : memref<10x128xf32, #tpu.memory_space<vmem>>, vector<1x128xf32>
    %26 = vector.broadcast %25 : vector<1x128xf32> to vector<8x128xf32>
    %27 = arith.addf %24, %26 : vector<8x128xf32>
    %cst_12 = arith.constant 0.000000e+00 : f32
    %28 = vector.broadcast %cst_12 : f32 to vector<8x128xf32>
    %29 = arith.maximumf %27, %28 : vector<8x128xf32>
    %c0_13 = arith.constant 0 : index
    %c0_14 = arith.constant 0 : index
    %c0_15 = arith.constant 0 : index
    %30 = vector.load %arg2[%c0_13, %c0_14, %c0_15] : memref<3x128x128xf32, #tpu.memory_space<vmem>>, vector<1x128x128xf32>
    %31 = vector.shape_cast %30 : vector<1x128x128xf32> to vector<128x128xf32>
    %cst_16 = arith.constant dense<0.000000e+00> : vector<8x128xf32>
    %32 = tpu.matmul %29, %31, %cst_16 {dimension_numbers = #tpu.dot_dimension_numbers<[1], [0], [0], [1], [0, 0, 1, 1], [], []>} : vector<8x128xf32>, vector<128x128xf32>, vector<8x128xf32> -> vector<8x128xf32>
    %c3 = arith.constant 3 : index
    %c0_17 = arith.constant 0 : index
    %33 = vector.load %arg3[%c3, %c0_17] : memref<10x128xf32, #tpu.memory_space<vmem>>, vector<1x128xf32>
    %34 = vector.broadcast %33 : vector<1x128xf32> to vector<8x128xf32>
    %35 = arith.addf %32, %34 : vector<8x128xf32>
    %cst_18 = arith.constant dense<0.000000e+00> : vector<128xf32>
    %36 = vector.multi_reduction <add>, %35, %cst_18 [0] : vector<8x128xf32> to vector<128xf32>
    %37 = vector.shape_cast %36 : vector<128xf32> to vector<1x128xf32>
    %cst_19 = arith.constant 8.000000e+00 : f32
    %38 = vector.broadcast %cst_19 : f32 to vector<1x128xf32>
    %39 = arith.divf %37, %38 : vector<1x128xf32>
    %40 = vector.broadcast %39 : vector<1x128xf32> to vector<8x128xf32>
    %41 = arith.subf %35, %40 : vector<8x128xf32>
    %42 = arith.mulf %41, %41 : vector<8x128xf32>
    %cst_20 = arith.constant dense<0.000000e+00> : vector<128xf32>
    %43 = vector.multi_reduction <add>, %42, %cst_20 [0] : vector<8x128xf32> to vector<128xf32>
    %44 = vector.shape_cast %43 : vector<128xf32> to vector<1x128xf32>
    %cst_21 = arith.constant 8.000000e+00 : f32
    %45 = vector.broadcast %cst_21 : f32 to vector<1x128xf32>
    %46 = arith.divf %44, %45 : vector<1x128xf32>
    %cst_22 = arith.constant 9.99999974E-6 : f32
    %47 = vector.broadcast %cst_22 : f32 to vector<1x128xf32>
    %48 = arith.addf %46, %47 : vector<1x128xf32>
    %49 = math.rsqrt %48 : vector<1x128xf32>
    %50 = vector.broadcast %49 : vector<1x128xf32> to vector<8x128xf32>
    %51 = arith.mulf %41, %50 : vector<8x128xf32>
    %c4 = arith.constant 4 : index
    %c0_23 = arith.constant 0 : index
    %52 = vector.load %arg3[%c4, %c0_23] : memref<10x128xf32, #tpu.memory_space<vmem>>, vector<1x128xf32>
    %53 = vector.broadcast %52 : vector<1x128xf32> to vector<8x128xf32>
    %54 = arith.mulf %51, %53 : vector<8x128xf32>
    %c5 = arith.constant 5 : index
    %c0_24 = arith.constant 0 : index
    %55 = vector.load %arg3[%c5, %c0_24] : memref<10x128xf32, #tpu.memory_space<vmem>>, vector<1x128xf32>
    %56 = vector.broadcast %55 : vector<1x128xf32> to vector<8x128xf32>
    %57 = arith.addf %54, %56 : vector<8x128xf32>
    %cst_25 = arith.constant 0.000000e+00 : f32
    %58 = vector.broadcast %cst_25 : f32 to vector<8x128xf32>
    %59 = arith.maximumf %57, %58 : vector<8x128xf32>
    %c1_26 = arith.constant 1 : index
    %c0_27 = arith.constant 0 : index
    %c0_28 = arith.constant 0 : index
    %60 = vector.load %arg2[%c1_26, %c0_27, %c0_28] : memref<3x128x128xf32, #tpu.memory_space<vmem>>, vector<1x128x128xf32>
    %61 = vector.shape_cast %60 : vector<1x128x128xf32> to vector<128x128xf32>
    %cst_29 = arith.constant dense<0.000000e+00> : vector<8x128xf32>
    %62 = tpu.matmul %59, %61, %cst_29 {dimension_numbers = #tpu.dot_dimension_numbers<[1], [0], [0], [1], [0, 0, 1, 1], [], []>} : vector<8x128xf32>, vector<128x128xf32>, vector<8x128xf32> -> vector<8x128xf32>
    %c6 = arith.constant 6 : index
    %c0_30 = arith.constant 0 : index
    %63 = vector.load %arg3[%c6, %c0_30] : memref<10x128xf32, #tpu.memory_space<vmem>>, vector<1x128xf32>
    %64 = vector.broadcast %63 : vector<1x128xf32> to vector<8x128xf32>
    %65 = arith.addf %62, %64 : vector<8x128xf32>
    %cst_31 = arith.constant dense<0.000000e+00> : vector<128xf32>
    %66 = vector.multi_reduction <add>, %65, %cst_31 [0] : vector<8x128xf32> to vector<128xf32>
    %67 = vector.shape_cast %66 : vector<128xf32> to vector<1x128xf32>
    %cst_32 = arith.constant 8.000000e+00 : f32
    %68 = vector.broadcast %cst_32 : f32 to vector<1x128xf32>
    %69 = arith.divf %67, %68 : vector<1x128xf32>
    %70 = vector.broadcast %69 : vector<1x128xf32> to vector<8x128xf32>
    %71 = arith.subf %65, %70 : vector<8x128xf32>
    %72 = arith.mulf %71, %71 : vector<8x128xf32>
    %cst_33 = arith.constant dense<0.000000e+00> : vector<128xf32>
    %73 = vector.multi_reduction <add>, %72, %cst_33 [0] : vector<8x128xf32> to vector<128xf32>
    %74 = vector.shape_cast %73 : vector<128xf32> to vector<1x128xf32>
    %cst_34 = arith.constant 8.000000e+00 : f32
    %75 = vector.broadcast %cst_34 : f32 to vector<1x128xf32>
    %76 = arith.divf %74, %75 : vector<1x128xf32>
    %cst_35 = arith.constant 9.99999974E-6 : f32
    %77 = vector.broadcast %cst_35 : f32 to vector<1x128xf32>
    %78 = arith.addf %76, %77 : vector<1x128xf32>
    %79 = math.rsqrt %78 : vector<1x128xf32>
    %80 = vector.broadcast %79 : vector<1x128xf32> to vector<8x128xf32>
    %81 = arith.mulf %71, %80 : vector<8x128xf32>
    %c7 = arith.constant 7 : index
    %c0_36 = arith.constant 0 : index
    %82 = vector.load %arg3[%c7, %c0_36] : memref<10x128xf32, #tpu.memory_space<vmem>>, vector<1x128xf32>
    %83 = vector.broadcast %82 : vector<1x128xf32> to vector<8x128xf32>
    %84 = arith.mulf %81, %83 : vector<8x128xf32>
    %c8 = arith.constant 8 : index
    %c0_37 = arith.constant 0 : index
    %85 = vector.load %arg3[%c8, %c0_37] : memref<10x128xf32, #tpu.memory_space<vmem>>, vector<1x128xf32>
    %86 = vector.broadcast %85 : vector<1x128xf32> to vector<8x128xf32>
    %87 = arith.addf %84, %86 : vector<8x128xf32>
    %cst_38 = arith.constant 0.000000e+00 : f32
    %88 = vector.broadcast %cst_38 : f32 to vector<8x128xf32>
    %89 = arith.maximumf %87, %88 : vector<8x128xf32>
    %c2_39 = arith.constant 2 : index
    %c0_40 = arith.constant 0 : index
    %c0_41 = arith.constant 0 : index
    %90 = vector.load %arg2[%c2_39, %c0_40, %c0_41] : memref<3x128x128xf32, #tpu.memory_space<vmem>>, vector<1x128x128xf32>
    %91 = vector.shape_cast %90 : vector<1x128x128xf32> to vector<128x128xf32>
    %cst_42 = arith.constant dense<0.000000e+00> : vector<8x128xf32>
    %92 = tpu.matmul %89, %91, %cst_42 {dimension_numbers = #tpu.dot_dimension_numbers<[1], [0], [0], [1], [0, 0, 1, 1], [], []>} : vector<8x128xf32>, vector<128x128xf32>, vector<8x128xf32> -> vector<8x128xf32>
    %c9 = arith.constant 9 : index
    %c0_43 = arith.constant 0 : index
    %93 = vector.load %arg3[%c9, %c0_43] : memref<10x128xf32, #tpu.memory_space<vmem>>, vector<1x128xf32>
    %94 = vector.broadcast %93 : vector<1x128xf32> to vector<8x128xf32>
    %95 = arith.addf %92, %94 : vector<8x128xf32>
    %cst_44 = arith.constant dense<0xFF800000> : vector<8xf32>
    %96 = vector.multi_reduction <maximumf>, %95, %cst_44 [1] : vector<8x128xf32> to vector<8xf32>
    %97 = vector.shape_cast %96 : vector<8xf32> to vector<8x1xf32>
    %98 = vector.broadcast %97 : vector<8x1xf32> to vector<8x128xf32>
    %99 = arith.subf %95, %98 : vector<8x128xf32>
    %100 = math.exp %99 : vector<8x128xf32>
    %cst_45 = arith.constant dense<0.000000e+00> : vector<8xf32>
    %101 = vector.multi_reduction <add>, %100, %cst_45 [1] : vector<8x128xf32> to vector<8xf32>
    %102 = vector.shape_cast %101 : vector<8xf32> to vector<8x1xf32>
    %103 = vector.broadcast %102 : vector<8x1xf32> to vector<8x128xf32>
    %104 = arith.divf %100, %103 : vector<8x128xf32>
    %c0_46 = arith.constant 0 : index
    %c0_47 = arith.constant 0 : index
    %105 = vector.load %arg4[%c0_46, %c0_47] : memref<8x128xf32, #tpu.memory_space<vmem>>, vector<8x128xf32>
    tpu.vector_store %arg4[%c0_46, %c0_47], %104 {strides = array<i32>} : memref<8x128xf32, #tpu.memory_space<vmem>>, vector<8x128xf32>,
    return
  }
}

</mosaic_0001>

<bundles_post_ra>
// kernel: tpu_custom_call.1
= control target key start
LH: loop header
LB: loop body
LE: loop exit
PB: predicated region body
PF: predicated region fallthrough
CT: control target
= control target key end

     0   :  { %9 = vsyncpa [#allocation3], 0  ;;  %s972_s0 = inlined_call_operand.hbm [shape: f32[8,16], index: 0, kind: input, shape index: {}]   ;;  %s973_s1 = inlined_call_operand.hbm [shape: f32[16,128], index: 1, kind: input, shape index: {}]   ;;  %s974_s2 = inlined_call_operand.hbm [shape: f32[3,128,128], index: 2, kind: input, shape index: {}]   ;;  %s975_s3 = inlined_call_operand.hbm [shape: f32[10,128], index: 3, kind: input, shape index: {}]   ;;  %s976_s4 = inlined_call_operand.hbm [shape: f32[8,128], index: 4, kind: output, shape index: {}]  }
   0x1   :  { %10 = vsyncpa [#allocation6], 0 }
   0x2   :  { %11 = vsyncpa [#allocation9], 0 }
   0x3   :  { %12 = vsyncpa [#allocation4], 0  ;;  %s856_s15 = smov [#allocation5]  }
   0x4   :  { %s28_s16 = sshll.u32 %s856_s15, 4  ;;  %s29_s16 = int_to_ptr.vmem [resolvable:$true] %s28_s16 }
   0x5   :  { %s756_s17 = scalar_lea.vmem %s29_s16, 256  ;;  %p761_p1 = scmp.lt.s32.totalorder %s29_s16, %s29_s16 }
   0x6   :  { %p757_p0 = scmp.ne.s32.totalorder %s29_s16, %s756_s17  ;;  %p762_p2 = scmp.lt.s32.totalorder %s756_s17, %s756_s17 }
   0x8   :  { %p763_p3 = por %p762_p2, %p761_p1 }
   0xa   :  { %p764_p4 = pnand %p763_p3, %p757_p0 }
   0xc   :  { %767 = shalt.err (!%p764_p4)
}
   0xd   :  { %s857_s18 = smov 128   ;;  %s858_s19 = smov 8  }
   0xe   :  { %34 = dma.hbm_to_vmem [thread:$0]  %s973_s1, 256, %s29_s16, [#allocation6], %s857_s18, %s857_s18, %s858_s19  }
   0xf   :  { %s859_s22 = smov [#allocation2]   ;;  %s860_s24 = smov [#allocation7]  }
  0x10   :  { %s19_s23 = sshll.u32 %s859_s22, 4  ;;  %s40_s25 = sshll.u32 %s860_s24, 4  ;;  %s20_s23 = int_to_ptr.vmem [resolvable:$true] %s19_s23  ;;  %s41_s25 = int_to_ptr.vmem [resolvable:$true] %s40_s25 }
  0x11   :  { %s776_s26 = scalar_lea.vmem %s20_s23, 128  ;;  %p781_p6 = scmp.lt.s32.totalorder %s20_s23, %s20_s23 }
  0x12   :  { %p777_p5 = scmp.ne.s32.totalorder %s20_s23, %s776_s26  ;;  %p782_p7 = scmp.lt.s32.totalorder %s776_s26, %s776_s26 }
  0x14   :  { %p783_p8 = por %p782_p7, %p781_p6 }
  0x16   :  { %p784_p9 = pnand %p783_p8, %p777_p5 }
  0x18   :  { %787 = shalt.err (!%p784_p9)
}
  0x19   :  { %22 = dma.hbm_to_vmem [thread:$0]  %s972_s0, 128, %s20_s23, [#allocation3]  }
  0x1a   :  { %s796_s29 = scalar_lea.vmem %s41_s25, 6144  ;;  %p801_p11 = scmp.lt.s32.totalorder %s41_s25, %s41_s25 }
  0x1b   :  { %p797_p10 = scmp.ne.s32.totalorder %s41_s25, %s796_s29  ;;  %p802_p12 = scmp.lt.s32.totalorder %s796_s29, %s796_s29 }
  0x1d   :  { %p803_p13 = por %p802_p12, %p801_p11 }
  0x1f   :  { %p804_p0 = pnand %p803_p13, %p797_p10 }
  0x21   :  { %807 = shalt.err (!%p804_p0)
}
  0x22   :  { %46 = dma.hbm_to_vmem [thread:$0]  %s974_s2, 6144, %s41_s25, [#allocation6], %s857_s18, %s857_s18, %s858_s19  }
  0x23   :  { %s861_s5 = smov [#allocation8]  }
  0x24   :  { %s52_s6 = sshll.u32 %s861_s5, 4  ;;  %s53_s6 = int_to_ptr.vmem [resolvable:$true] %s52_s6 }
  0x25   :  { %s816_s7 = scalar_lea.vmem %s53_s6, 256  ;;  %p821_p2 = scmp.lt.s32.totalorder %s53_s6, %s53_s6 }
  0x26   :  { %p817_p1 = scmp.ne.s32.totalorder %s53_s6, %s816_s7  ;;  %p822_p3 = scmp.lt.s32.totalorder %s816_s7, %s816_s7 }
  0x28   :  { %p823_p4 = por %p822_p3, %p821_p2 }
  0x2a   :  { %p824_p5 = pnand %p823_p4, %p817_p1 }
  0x2c   :  { %827 = shalt.err (!%p824_p5)
}
  0x2d   :  { %58 = dma.hbm_to_vmem [thread:$0]  %s975_s3, 256, %s53_s6, [#allocation9], %s857_s18, %s857_s18, %s858_s19  }
  0x2e   :  { %848 = dma.done.wait [#allocation3], 128  }
  0x2f   :  { %849 = vsyncadd [#allocation3], 4294967168 }
  0x30   :  { %850 = dma.done.wait [#allocation6], 6400  }
  0x31   :  { %851 = vsyncadd [#allocation6], 4294960896 }
  0x32   :  { %852 = dma.done.wait [#allocation9], 256  }
  0x33   :  { %853 = vsyncadd [#allocation9], 4294967040  ;;  %v862_v0 = vmov 0.0   ;;  %vm863_vm0 = vmmov 0   ;;  %v73_v1 = vld [vmem:[#allocation5 + $0x8] sm:$0xff]  ;;  %v72_v2 = vld [vmem:[#allocation5] sm:$0xff] }
  0x34   :  { %617 = vmatprep.subr.mxu0 %v862_v0  ;;  %621 = vmatprep.mubr.msk.f32.mxu0 %vm863_vm0, %v862_v0  ;;  %v71_v3 = vld [vmem:[#allocation2] sm:$0xff]  ;;  %vm79_vm1 = vcmask 130048   ;;  %v201_v4 = vld [vmem:[#allocation7 + $0x78] sm:$0xff]  ;;  %v200_v5 = vld [vmem:[#allocation7 + $0x70] sm:$0xff]  ;;  %s864_s2 = smov [#allocation10]  }
  0x35   :  { %624 = vmatprep.subr.mxu1 %v862_v0  ;;  %656 = vmatprep.mubr.msk.f32.mxu1 %vm863_vm0, %v862_v0  ;;  %v199_v6 = vld [vmem:[#allocation7 + $0x68] sm:$0xff]  ;;  %v198_v7 = vld [vmem:[#allocation7 + $0x60] sm:$0xff]  ;;  %v197_v8 = vld [vmem:[#allocation7 + $0x58] sm:$0xff]  ;;  %s541_s3 = sshll.u32 %s864_s2, 4  ;;  %s542_s3 = int_to_ptr.vmem [resolvable:$true] %s541_s3 }
  0x36   :  { %618 = vmatpush3.msra.mxu0 %v73_v1  ;;  %625 = vmatpush3.msra.mxu1 %v201_v4  ;;  %v196_v9 = vld [vmem:[#allocation7 + $0x50] sm:$0xff]  ;;  %v195_v10 = vld [vmem:[#allocation7 + $0x48] sm:$0xff]  ;;  %v194_v11 = vld [vmem:[#allocation7 + $0x40] sm:$0xff]  ;;  %s828_s9 = scalar_lea.vmem %s542_s3, 128  ;;  %p833_p7 = scmp.lt.s32.totalorder %s542_s3, %s542_s3 }
  0x37   :  { %619 = vmatprep.subr.mxu0 %v862_v0  ;;  %626 = vmatprep.subr.mxu1 %v862_v0  ;;  %v193_v12 = vld [vmem:[#allocation7 + $0x38] sm:$0xff]  ;;  %v192_v13 = vld [vmem:[#allocation7 + $0x30] sm:$0xff]  ;;  %v191_v14 = vld [vmem:[#allocation7 + $0x28] sm:$0xff]  ;;  %p829_p6 = scmp.ne.s32.totalorder %s542_s3, %s828_s9  ;;  %p834_p8 = scmp.lt.s32.totalorder %s828_s9, %s828_s9 }
  0x38   :  { %620 = vmatpush3.msra.mxu0 %v72_v2  ;;  %627 = vmatpush3.msra.mxu1 %v200_v5  ;;  %v190_v15 = vld [vmem:[#allocation7 + $0x20] sm:$0xff]  ;;  %v189_v16 = vld [vmem:[#allocation7 + $0x18] sm:$0xff]  ;;  %v188_v17 = vld [vmem:[#allocation7 + $0x10] sm:$0xff] }
  0x39   :  { %622 = vmatmul.mubr.msk.f32.vlgmr.msra.gmra.mxu0 %vm79_vm1, %v71_v3  ;;  %659 = vmatprep.subr.mxu0 %v862_v0  ;;  %v187_v18 = vld [vmem:[#allocation7 + $0x8] sm:$0xff]  ;;  %v186_v19 = vld [vmem:[#allocation7] sm:$0xff]  ;;  %v325_v48 = vld [vmem:[#allocation7 + $0xf8] sm:$0xff]  ;;  %p835_p9 = por %p834_p8, %p833_p7 }
  0x3a   :  { %691 = vmatprep.mubr.msk.f32.mxu0 %vm863_vm0, %v862_v0  ;;  %628 = vmatprep.subr.mxu1 %v862_v0  ;;  %v552_v20 = vld [vmem:[#allocation8] ss:$0 sm:$0xff]  ;;  %v554_v42 = vld [vmem:[#allocation8 + $0x1] ss:$0 sm:$0xff]  ;;  %v555_v44 = vld [vmem:[#allocation8 + $0x2] ss:$0 sm:$0xff] }
  0x3b   :  { %629 = vmatpush3.msra.mxu1 %v199_v6  ;;  %660 = vmatpush3.msra.mxu0 %v325_v48  ;;  %v324_v49 = vld [vmem:[#allocation7 + $0xf0] sm:$0xff]  ;;  %v323_v50 = vld [vmem:[#allocation7 + $0xe8] sm:$0xff]  ;;  %v322_v51 = vld [vmem:[#allocation7 + $0xe0] sm:$0xff]  ;;  %p836_p10 = pnand %p835_p9, %p829_p6 }
  0x3c   :  { %630 = vmatprep.subr.mxu1 %v862_v0  ;;  %661 = vmatprep.subr.mxu0 %v862_v0  ;;  %v321_v52 = vld [vmem:[#allocation7 + $0xd8] sm:$0xff]  ;;  %v320_v53 = vld [vmem:[#allocation7 + $0xd0] sm:$0xff]  ;;  %v319_v54 = vld [vmem:[#allocation7 + $0xc8] sm:$0xff] }
  0x3d   :  { %631 = vmatpush3.msra.mxu1 %v198_v7  ;;  %662 = vmatpush3.msra.mxu0 %v324_v49  ;;  %v318_v55 = vld [vmem:[#allocation7 + $0xc0] sm:$0xff]  ;;  %v317_v56 = vld [vmem:[#allocation7 + $0xb8] sm:$0xff]  ;;  %v316_v57 = vld [vmem:[#allocation7 + $0xb0] sm:$0xff] }
  0x3e   :  { %632 = vmatprep.subr.mxu1 %v862_v0  ;;  %663 = vmatprep.subr.mxu0 %v862_v0  ;;  %v315_v58 = vld [vmem:[#allocation7 + $0xa8] sm:$0xff]  ;;  %v314_v59 = vld [vmem:[#allocation7 + $0xa0] sm:$0xff]  ;;  %v313_v60 = vld [vmem:[#allocation7 + $0x98] sm:$0xff] }
  0x3f   :  { %633 = vmatpush3.msra.mxu1 %v197_v8  ;;  %664 = vmatpush3.msra.mxu0 %v323_v50  ;;  %v312_v61 = vld [vmem:[#allocation7 + $0x90] sm:$0xff]  ;;  %v311_v62 = vld [vmem:[#allocation7 + $0x88] sm:$0xff]  ;;  %v310_v63 = vld [vmem:[#allocation7 + $0x80] sm:$0xff] }
  0x40   :  { %634 = vmatprep.subr.mxu1 %v862_v0  ;;  %665 = vmatprep.subr.mxu0 %v862_v0  ;;  %v556_v1 = vld [vmem:[#allocation8 + $0x3] ss:$0 sm:$0xff] }
  0x41   :  { %635 = vmatpush3.msra.mxu1 %v196_v9  ;;  %666 = vmatpush3.msra.mxu0 %v322_v51 }
  0x42   :  { %636 = vmatprep.subr.mxu1 %v862_v0  ;;  %667 = vmatprep.subr.mxu0 %v862_v0 }
  0x43   :  { %637 = vmatpush3.msra.mxu1 %v195_v10  ;;  %668 = vmatpush3.msra.mxu0 %v321_v52 }
  0x44   :  { %638 = vmatprep.subr.mxu1 %v862_v0  ;;  %669 = vmatprep.subr.mxu0 %v862_v0 }
  0x45   :  { %639 = vmatpush3.msra.mxu1 %v194_v11  ;;  %670 = vmatpush3.msra.mxu0 %v320_v53 }
  0x46   :  { %640 = vmatprep.subr.mxu1 %v862_v0  ;;  %671 = vmatprep.subr.mxu0 %v862_v0 }
  0x47   :  { %641 = vmatpush3.msra.mxu1 %v193_v12  ;;  %672 = vmatpush3.msra.mxu0 %v319_v54 }
  0x48   :  { %642 = vmatprep.subr.mxu1 %v862_v0  ;;  %673 = vmatprep.subr.mxu0 %v862_v0 }
  0x49   :  { %643 = vmatpush3.msra.mxu1 %v192_v13  ;;  %674 = vmatpush3.msra.mxu0 %v318_v55 }
  0x4a   :  { %644 = vmatprep.subr.mxu1 %v862_v0  ;;  %675 = vmatprep.subr.mxu0 %v862_v0 }
  0x4b   :  { %645 = vmatpush3.msra.mxu1 %v191_v14  ;;  %676 = vmatpush3.msra.mxu0 %v317_v56 }
  0x4c   :  { %646 = vmatprep.subr.mxu1 %v862_v0  ;;  %677 = vmatprep.subr.mxu0 %v862_v0 }
  0x4d   :  { %647 = vmatpush3.msra.mxu1 %v190_v15  ;;  %678 = vmatpush3.msra.mxu0 %v316_v57 }
  0x4e   :  { %648 = vmatprep.subr.mxu1 %v862_v0  ;;  %679 = vmatprep.subr.mxu0 %v862_v0 }
  0x4f   :  { %649 = vmatpush3.msra.mxu1 %v189_v16  ;;  %680 = vmatpush3.msra.mxu0 %v315_v58 }
  0x50   :  { %650 = vmatprep.subr.mxu1 %v862_v0  ;;  %681 = vmatprep.subr.mxu0 %v862_v0 }
  0x51   :  { %651 = vmatpush3.msra.mxu1 %v188_v17  ;;  %682 = vmatpush3.msra.mxu0 %v314_v59 }
  0x52   :  { %652 = vmatprep.subr.mxu1 %v862_v0  ;;  %683 = vmatprep.subr.mxu0 %v862_v0 }
  0x53   :  { %653 = vmatpush3.msra.mxu1 %v187_v18  ;;  %684 = vmatpush3.msra.mxu0 %v313_v60 }
  0x54   :  { %654 = vmatprep.subr.mxu1 %v862_v0  ;;  %685 = vmatprep.subr.mxu0 %v862_v0 }
  0x55   :  { %655 = vmatpush3.msra.mxu1 %v186_v19  ;;  %686 = vmatpush3.msra.mxu0 %v312_v61 }
  0x56   :  { %694 = vmatprep.subr.mxu1 %v862_v0  ;;  %687 = vmatprep.subr.mxu0 %v862_v0 }
  0x57   :  { %688 = vmatpush3.msra.mxu0 %v311_v62 }
  0x58   :  { %689 = vmatprep.subr.mxu0 %v862_v0 }
  0x59   :  { %690 = vmatpush3.msra.mxu0 %v310_v63 }
  0xf9   :  { %v149_v21 = vpop.f32.mrf.mxu0 }
  0xfa   :  { %v150_v22 = vadd.f32 %v552_v20, %v149_v21 }
  0xfb   :  { %v623_v23 = vpop.f32.mrf.mxu0 }
  0xfc   :  { %v153_v24 = vrot.slane %v150_v22, 4  ;;  %v557_v23 = vld [vmem:[#allocation8 + $0x4] ss:$0 sm:$0xff] }
  0xfe   :  { %v154_v25 = vadd.f32 %v153_v24, %v150_v22 }
 0x100   :  { %v155_v26 = vrot.slane %v154_v25, 2 }
 0x102   :  { %v156_v27 = vadd.f32 %v155_v26, %v154_v25  ;;  %v558_v25 = vld [vmem:[#allocation8 + $0x5] ss:$0 sm:$0xff] }
 0x104   :  { %v157_v28 = vrot.slane %v156_v27, 1 }
 0x106   :  { %v158_v29 = vadd.f32 %v157_v28, %v156_v27 }
 0x108   :  { %v160_v30 = vmul.f32 0.125, %v158_v29  ;;  %v449_v29 = vld [vmem:[#allocation7 + $0x178] sm:$0xff] }
 0x10a   :  { %v161_v31 = vsub.f32 %v150_v22, %v160_v30  ;;  %v448_v30 = vld [vmem:[#allocation7 + $0x170] sm:$0xff] }
 0x10c   :  { %v162_v32 = vmul.f32 %v161_v31, %v161_v31 }
 0x10e   :  { %v163_v33 = vrot.slane %v162_v32, 4 }
 0x110   :  { %v164_v34 = vadd.f32 %v163_v33, %v162_v32  ;;  %v446_v32 = vld [vmem:[#allocation7 + $0x160] sm:$0xff]  ;;  %v445_v33 = vld [vmem:[#allocation7 + $0x158] sm:$0xff] }
 0x112   :  { %v165_v35 = vrot.slane %v164_v34, 2 }
 0x114   :  { %v166_v36 = vadd.f32 %v165_v35, %v164_v34  ;;  %v444_v34 = vld [vmem:[#allocation7 + $0x150] sm:$0xff]  ;;  %v443_v35 = vld [vmem:[#allocation7 + $0x148] sm:$0xff] }
 0x116   :  { %v167_v37 = vrot.slane %v166_v36, 1 }
 0x118   :  { %v168_v38 = vadd.f32 %v167_v37, %v166_v36  ;;  %v442_v36 = vld [vmem:[#allocation7 + $0x140] sm:$0xff]  ;;  %v441_v37 = vld [vmem:[#allocation7 + $0x138] sm:$0xff] }
 0x11a   :  { %v169_v39 = vmul.f32 0.125, %v168_v38  ;;  %v440_v38 = vld [vmem:[#allocation7 + $0x130] sm:$0xff] }
 0x11c   :  { %v170_v40 = vadd.f32 1e-05, %v169_v39  ;;  %v439_v39 = vld [vmem:[#allocation7 + $0x128] sm:$0xff] }
 0x11e   :  { %738 = vrsqrt.f32 %v170_v40  ;;  %v438_v40 = vld [vmem:[#allocation7 + $0x120] sm:$0xff] }
 0x12b   :  { %v739_v41 = vpop.eup %738 }
 0x12c   :  { %v172_v43 = vmul.f32 %v739_v41, %v161_v31  ;;  %v447_v31 = vld [vmem:[#allocation7 + $0x168] sm:$0xff]  ;;  %v437_v41 = vld [vmem:[#allocation7 + $0x118] sm:$0xff] }
 0x12e   :  { %v178_v45 = vmul.f32 %v554_v42, %v172_v43  ;;  %v436_v42 = vld [vmem:[#allocation7 + $0x110] sm:$0xff]  ;;  %v435_v43 = vld [vmem:[#allocation7 + $0x108] sm:$0xff] }
 0x130   :  { %v184_v46 = vadd.f32 %v555_v44, %v178_v45  ;;  %v434_v44 = vld [vmem:[#allocation7 + $0x100] sm:$0xff] }
 0x131   :  { %v559_v45 = vld [vmem:[#allocation8 + $0x6] ss:$0 sm:$0xff] }
 0x132   :  { %v185_v47 = vmax.f32 %v184_v46, 0.0 }
 0x134   :  { %657 = vmatmul.mubr.f32.vlgmr.msra.gmra.mxu1 %v185_v47 }
 0x135   :  { %726 = vmatprep.mubr.msk.f32.mxu1 %vm863_vm0, %v862_v0  ;;  %695 = vmatpush3.msra.mxu1 %v449_v29 }
 0x136   :  { %696 = vmatprep.subr.mxu1 %v862_v0 }
 0x137   :  { %697 = vmatpush3.msra.mxu1 %v448_v30 }
 0x138   :  { %698 = vmatprep.subr.mxu1 %v862_v0 }
 0x139   :  { %699 = vmatpush3.msra.mxu1 %v447_v31 }
 0x13a   :  { %700 = vmatprep.subr.mxu1 %v862_v0 }
 0x13b   :  { %701 = vmatpush3.msra.mxu1 %v446_v32 }
 0x13c   :  { %702 = vmatprep.subr.mxu1 %v862_v0 }
 0x13d   :  { %703 = vmatpush3.msra.mxu1 %v445_v33 }
 0x13e   :  { %704 = vmatprep.subr.mxu1 %v862_v0 }
 0x13f   :  { %705 = vmatpush3.msra.mxu1 %v444_v34 }
 0x140   :  { %706 = vmatprep.subr.mxu1 %v862_v0 }
 0x141   :  { %707 = vmatpush3.msra.mxu1 %v443_v35 }
 0x142   :  { %708 = vmatprep.subr.mxu1 %v862_v0 }
 0x143   :  { %709 = vmatpush3.msra.mxu1 %v442_v36 }
 0x144   :  { %710 = vmatprep.subr.mxu1 %v862_v0 }
 0x145   :  { %711 = vmatpush3.msra.mxu1 %v441_v37 }
 0x146   :  { %712 = vmatprep.subr.mxu1 %v862_v0 }
 0x147   :  { %713 = vmatpush3.msra.mxu1 %v440_v38 }
 0x148   :  { %714 = vmatprep.subr.mxu1 %v862_v0 }
 0x149   :  { %715 = vmatpush3.msra.mxu1 %v439_v39 }
 0x14a   :  { %716 = vmatprep.subr.mxu1 %v862_v0 }
 0x14b   :  { %717 = vmatpush3.msra.mxu1 %v438_v40 }
 0x14c   :  { %718 = vmatprep.subr.mxu1 %v862_v0 }
 0x14d   :  { %719 = vmatpush3.msra.mxu1 %v437_v41 }
 0x14e   :  { %720 = vmatprep.subr.mxu1 %v862_v0 }
 0x14f   :  { %721 = vmatpush3.msra.mxu1 %v436_v42 }
 0x150   :  { %722 = vmatprep.subr.mxu1 %v862_v0 }
 0x151   :  { %723 = vmatpush3.msra.mxu1 %v435_v43 }
 0x152   :  { %724 = vmatprep.subr.mxu1 %v862_v0 }
 0x153   :  { %725 = vmatpush3.msra.mxu1 %v434_v44 }
 0x1f4   :  { %v273_v2 = vpop.f32.mrf.mxu1 }
 0x1f5   :  { %v274_v3 = vadd.f32 %v556_v1, %v273_v2 }
 0x1f6   :  { %v658_v4 = vpop.f32.mrf.mxu1 }
 0x1f7   :  { %v277_v5 = vrot.slane %v274_v3, 4 }
 0x1f9   :  { %v278_v6 = vadd.f32 %v277_v5, %v274_v3  ;;  %v561_v5 = vld [vmem:[#allocation8 + $0x8] ss:$0 sm:$0xff] }
 0x1fb   :  { %v279_v7 = vrot.slane %v278_v6, 2 }
 0x1fd   :  { %v280_v8 = vadd.f32 %v279_v7, %v278_v6 }
 0x1ff   :  { %v281_v9 = vrot.slane %v280_v8, 1 }
 0x201   :  { %v282_v10 = vadd.f32 %v281_v9, %v280_v8  ;;  %v562_v9 = vld [vmem:[#allocation8 + $0x9] ss:$0 sm:$0xff] }
 0x203   :  { %v283_v11 = vmul.f32 0.125, %v282_v10 }
 0x205   :  { %v284_v12 = vsub.f32 %v274_v3, %v283_v11  ;;  %v560_v3 = vld [vmem:[#allocation8 + $0x7] ss:$0 sm:$0xff] }
 0x207   :  { %v285_v13 = vmul.f32 %v284_v12, %v284_v12 }
 0x209   :  { %v286_v14 = vrot.slane %v285_v13, 4 }
 0x20b   :  { %v287_v15 = vadd.f32 %v286_v14, %v285_v13 }
 0x20d   :  { %v288_v16 = vrot.slane %v287_v15, 2 }
 0x20f   :  { %v289_v17 = vadd.f32 %v288_v16, %v287_v15 }
 0x211   :  { %v290_v18 = vrot.slane %v289_v17, 1 }
 0x213   :  { %v291_v19 = vadd.f32 %v290_v18, %v289_v17 }
 0x215   :  { %v292_v20 = vmul.f32 0.125, %v291_v19 }
 0x217   :  { %v293_v21 = vadd.f32 1e-05, %v292_v20 }
 0x219   :  { %740 = vrsqrt.f32 %v293_v21 }
 0x226   :  { %v741_v22 = vpop.eup %740 }
 0x227   :  { %v295_v24 = vmul.f32 %v741_v22, %v284_v12 }
 0x229   :  { %v301_v26 = vmul.f32 %v557_v23, %v295_v24 }
 0x22b   :  { %v307_v27 = vadd.f32 %v558_v25, %v301_v26 }
 0x22d   :  { %v308_v28 = vmax.f32 %v307_v27, 0.0 }
 0x22f   :  { %692 = vmatmul.mubr.f32.vlgmr.msra.gmra.mxu0 %v308_v28 }
 0x2ef   :  { %v397_v46 = vpop.f32.mrf.mxu0 }
 0x2f0   :  { %v398_v47 = vadd.f32 %v559_v45, %v397_v46 }
 0x2f1   :  { %v693_v48 = vpop.f32.mrf.mxu0 }
 0x2f2   :  { %v401_v49 = vrot.slane %v398_v47, 4 }
 0x2f4   :  { %v402_v50 = vadd.f32 %v401_v49, %v398_v47 }
 0x2f6   :  { %v403_v51 = vrot.slane %v402_v50, 2 }
 0x2f8   :  { %v404_v52 = vadd.f32 %v403_v51, %v402_v50 }
 0x2fa   :  { %v405_v53 = vrot.slane %v404_v52, 1 }
 0x2fc   :  { %v406_v54 = vadd.f32 %v405_v53, %v404_v52 }
 0x2fe   :  { %v407_v55 = vmul.f32 0.125, %v406_v54 }
 0x300   :  { %v408_v56 = vsub.f32 %v398_v47, %v407_v55 }
 0x302   :  { %v409_v57 = vmul.f32 %v408_v56, %v408_v56 }
 0x304   :  { %v410_v58 = vrot.slane %v409_v57, 4 }
 0x306   :  { %v411_v59 = vadd.f32 %v410_v58, %v409_v57 }
 0x308   :  { %v412_v60 = vrot.slane %v411_v59, 2 }
 0x30a   :  { %v413_v61 = vadd.f32 %v412_v60, %v411_v59 }
 0x30c   :  { %v414_v62 = vrot.slane %v413_v61, 1 }
 0x30e   :  { %v415_v0 = vadd.f32 %v414_v62, %v413_v61 }
 0x310   :  { %v416_v63 = vmul.f32 0.125, %v415_v0 }
 0x312   :  { %v417_v1 = vadd.f32 1e-05, %v416_v63 }
 0x314   :  { %742 = vrsqrt.f32 %v417_v1 }
 0x321   :  { %v743_v2 = vpop.eup %742 }
 0x322   :  { %v419_v4 = vmul.f32 %v743_v2, %v408_v56 }
 0x324   :  { %v425_v6 = vmul.f32 %v560_v3, %v419_v4 }
 0x326   :  { %v431_v7 = vadd.f32 %v561_v5, %v425_v6 }
 0x328   :  { %v432_v8 = vmax.f32 %v431_v7, 0.0 }
 0x32a   :  { %727 = vmatmul.mubr.f32.vlgmr.msra.gmra.mxu1 %v432_v8 }
 0x3ea   :  { %v521_v10 = vpop.f32.mrf.mxu1 }
 0x3eb   :  { %v522_v11 = vadd.f32 %v562_v9, %v521_v10 }
 0x3ec   :  { %v728_v12 = vpop.f32.mrf.mxu1 }
 0x3ed   :  { %525 = vmax.xlane.f32.xlu0 %v522_v11 }
 0x476   :  { %v526_v13 = vpop.xlane.xlu0 %525 }
 0x477   :  { %v527_v14 = vsub.f32 %v522_v11, %v526_v13 }
 0x479   :  { %v528_v15 = vmul.f32 1.442695, %v527_v14 }
 0x47b   :  { %744 = vpow2.f32 %v528_v15 }
 0x488   :  { %v745_v16 = vpop.eup %744 }
 0x489   :  { %530 = vadd.xlane.f32.xlu0 %v745_v16 }
 0x512   :  { %v531_v17 = vpop.xlane.xlu0 %530 }
 0x513   :  { %746 = vrcp.f32 %v531_v17 }
 0x520   :  { %v747_v18 = vpop.eup %746 }
 0x521   :  { %v533_v19 = vmul.f32 %v747_v18, %v745_v16 }
 0x523   :  { %534 = vst [vmem:[#allocation10] sm:$0xff] %v533_v19 }
 0x524   :  { %839 = shalt.err (!%p836_p10)
}
 0x525   :  { %544 = dma.vmem_to_hbm [thread:$0]  %s542_s3, 128, %s976_s4, [#allocation4]  }
 0x526   :  { %854 = dma.done.wait [#allocation4], 128  }
 0x527   :  { %855 = vsyncadd [#allocation4], 4294967168 }
 0x528   :  { %548 = vsyncpa [#allocation3], 1 }
 0x529   :  { %549 = vsyncpa [#allocation6], 1 }
 0x52a   :  { %550 = vsyncpa [#allocation9], 1 }
 0x52b   :  { %551 = vsyncpa [#allocation4], 1 }

</bundles_post_ra>
